<compile_context>
chip_gen: v6e
topology: v6e:2x2x1
jax: 0.10.0
libtpu: 0.0.40
codegen_flags: <defaults>
</compile_context>

<pallas_src>
import functools
import math

import jax
import jax.numpy as jnp
from jax.experimental import pallas as pl
from jax.experimental.pallas import tpu as pltpu

_LANE = 128
_SUBLANE = 8
_DEFAULT_TOK_BLK = 512
_ONEHOT_BUDGET_BYTES = 4 * 1024 * 1024          # (tok_blk, vocab) one-hot temporary
_ONE_HOT_MAX_VOCAB = 2048                       # one-hot MXU path only for small vocab
_MAX_RESIDENT_TABLE_BYTES = 48 * 1024 * 1024    # absolute cap on the resident table
_DMA_RING = 16                                  # in-flight row DMAs on the HBM path (pow2)


def _round_up(x, m):
    return (x + m - 1) // m * m


def _vmem_capacity_bytes():
    """Per-core VMEM capacity; conservative fallback if the query is unavailable."""
    try:
        info = pltpu.get_tpu_info()
        cap = getattr(info, "vmem_capacity_bytes", None)
        if cap:
            return int(cap)
    except Exception:
        pass
    return 64 * 1024 * 1024      # conservative default (v7x per-core VMEM)


# --------------------------------------------------------------------------- #
# Kernels
# --------------------------------------------------------------------------- #
def _embed_onehot_kernel(ids_ref, table_ref, out_ref, *, scale):
    """Small-vocab fast path: scale-folded one-hot x resident table on the MXU."""
    tok_blk = out_ref.shape[0]
    vocab = table_ref.shape[0]
    ids = ids_ref[...]                                              # (tok_blk, 1) int32
    iota = jax.lax.broadcasted_iota(jnp.int32, (tok_blk, vocab), 1)  # (tok_blk, vocab)
    onehot = jnp.where(ids == iota, jnp.float32(scale),
                       jnp.float32(0.0)).astype(table_ref.dtype)
    out = jnp.dot(onehot, table_ref[...], preferred_element_type=jnp.float32)
    out_ref[...] = out.astype(out_ref.dtype)


def _embed_vmem_gather_kernel(ids_ref, table_ref, out_ref, *, scale):
    """Resident-table row gather: 8-way static unroll, scale fused into each store."""
    tok_blk = out_ref.shape[0]

    @pl.loop(0, tok_blk // _SUBLANE)
    def _grp(g):
        base = pl.multiple_of(g * _SUBLANE, _SUBLANE)
        # Static inner unroll fills the vld/vst issue slots per bundle.
        for j in range(_SUBLANE):
            row = ids_ref[0, base + j]
            out_ref[base + j, :] = table_ref[row, :] * scale


def _embed_hbm_gather_kernel(ids_ref, table_hbm_ref, out_ref, stage_ref, sem_ref,
                             *, scale, ring):
    """Large-vocab path: per-row HBM DMAs through a bounded semaphore ring."""
    tok_blk = out_ref.shape[0]

    def _copy(t, row):
        return pltpu.make_async_copy(
            table_hbm_ref.at[pl.ds(row, 1), :],   # (1, dm) row in HBM
            stage_ref.at[pl.ds(t, 1), :],         # (1, dm) staging row in VMEM
            sem_ref.at[t & (ring - 1)],
        )

    def _wait_slot(slot):
        # Wait descriptor only needs the matching transfer size + the right semaphore.
        pltpu.make_async_copy(
            table_hbm_ref.at[pl.ds(0, 1), :],
            stage_ref.at[pl.ds(0, 1), :],
            sem_ref.at[slot],
        ).wait()

    @pl.loop(0, tok_blk)
    def _issue(t):
        row = ids_ref[0, t]          # read the id before any semaphore wait

        @pl.when(t >= ring)
        def _():                     # free the ring slot before reusing it
            _wait_slot(t & (ring - 1))

        _copy(t, row).start()

    @pl.loop(0, min(ring, tok_blk))
    def _drain(s):
        _wait_slot(s)

    # Single fused scale + store of the whole staged tile (no extra rescale pass).
    # TODO(synk): cross-grid-step double buffering of the staging tile (overlap next
    # block's row DMAs with this block's writeback) is a further HBM-path win.
    out_ref[...] = stage_ref[...] * scale


# --------------------------------------------------------------------------- #
# Wrapper
# --------------------------------------------------------------------------- #
def input_embeddings(ids, emb_table, *, tok_blk=None, path=None):
    """ids: (...,) int token ids; emb_table: (vocab, d_model). Returns (..., d_model)."""
    orig_shape = tuple(ids.shape)
    vocab, d_model = emb_table.shape
    scale = float(math.sqrt(d_model))
    itemsize = jnp.dtype(emb_table.dtype).itemsize

    # Lane-dense output tiles: pad d_model to a multiple of 128 (unmasked vst).
    dm = _round_up(d_model, _LANE)
    if dm != d_model:
        emb_table = jnp.pad(emb_table, ((0, 0), (0, dm - d_model)))

    # Flatten + clamp (torch raises on OOB ids; here bad ids map to valid rows
    # instead of triggering an out-of-bounds DMA).
    flat_ids = jnp.clip(jnp.reshape(ids, (-1,)).astype(jnp.int32), 0, vocab - 1)
    n_tok = int(flat_ids.shape[0])

    table_bytes = vocab * dm * itemsize
    vmem_cap = _vmem_capacity_bytes()
    tile_budget = 4 * 1024 * 1024 if vmem_cap >= (100 << 20) else 2 * 1024 * 1024

    if path is None:
        # Generation-aware resident-table threshold: ~1/3 of per-core VMEM
        # (budget assumes the resident table may be double-buffered).
        resident_limit = min(vmem_cap // 3, _MAX_RESIDENT_TABLE_BYTES)
        if table_bytes <= resident_limit:
            path = "onehot" if vocab <= _ONE_HOT_MAX_VOCAB else "gather"
        else:
            path = "hbm"
    assert path in ("onehot", "gather", "hbm"), path

    # Tokens per grid step: sublane multiple, sized against VMEM tile budgets.
    limit = tile_budget // (dm * itemsize)
    if path == "onehot":
        limit = min(limit, _ONEHOT_BUDGET_BYTES // (vocab * 4))
    limit = max(_SUBLANE, limit // _SUBLANE * _SUBLANE)
    tb = _DEFAULT_TOK_BLK if tok_blk is None else tok_blk
    tb = min(tb, limit, _round_up(n_tok, _SUBLANE))
    tok_blk = max(_SUBLANE, tb // _SUBLANE * _SUBLANE)

    n_blocks = pl.cdiv(n_tok, tok_blk)
    n_pad = n_blocks * tok_blk
    if n_pad != n_tok:
        flat_ids = jnp.pad(flat_ids, (0, n_pad - n_tok))

    # Scoped-VMEM limit sized to actual usage + margin (generation-aware cap).
    out_tile_bytes = tok_blk * dm * itemsize
    est = 2 * out_tile_bytes + (1 << 20)
    if path in ("onehot", "gather"):
        est += 2 * table_bytes
    if path == "onehot":
        est += tok_blk * vocab * 4 + tok_blk * dm * 4
    if path == "hbm":
        est += out_tile_bytes
    vmem_limit = int(min(int(vmem_cap * 0.9), max(est + (4 << 20), 32 << 20)))

    out_spec = pl.BlockSpec((tok_blk, dm), lambda i: (i, 0))

    if path == "onehot":
        ids_arg = flat_ids.reshape(n_pad, 1)
        ids_spec = pl.BlockSpec((tok_blk, 1), lambda i: (i, 0))       # VMEM ids
        table_spec = pl.BlockSpec((vocab, dm), lambda i: (0, 0))      # VMEM-resident
        kernel = functools.partial(_embed_onehot_kernel, scale=scale)
        scratch_shapes = ()
    elif path == "gather":
        ids_arg = flat_ids.reshape(n_blocks, tok_blk)
        ids_spec = pl.BlockSpec((1, tok_blk), lambda i: (i, 0),
                                memory_space=pltpu.MemorySpace.SMEM)  # per-block ids
        table_spec = pl.BlockSpec((vocab, dm), lambda i: (0, 0))      # VMEM-resident
        kernel = functools.partial(_embed_vmem_gather_kernel, scale=scale)
        scratch_shapes = ()
    else:  # "hbm"
        ids_arg = flat_ids.reshape(n_blocks, tok_blk)
        ids_spec = pl.BlockSpec((1, tok_blk), lambda i: (i, 0),
                                memory_space=pltpu.MemorySpace.SMEM)
        table_spec = pl.BlockSpec(memory_space=pl.ANY)                # raw HBM ref
        kernel = functools.partial(_embed_hbm_gather_kernel, scale=scale,
                                   ring=_DMA_RING)
        scratch_shapes = (
            pltpu.VMEM((tok_blk, dm), emb_table.dtype),
            pltpu.SemaphoreType.DMA((_DMA_RING,)),
        )

    out_flat = pl.pallas_call(
        kernel,
        out_shape=jax.ShapeDtypeStruct((n_pad, dm), emb_table.dtype),
        grid_spec=pltpu.PrefetchScalarGridSpec(
            num_scalar_prefetch=0,
            grid=(n_blocks,),
            in_specs=[ids_spec, table_spec],
            out_specs=out_spec,
            scratch_shapes=scratch_shapes,
        ),
        compiler_params=pltpu.CompilerParams(
            dimension_semantics=("parallel",),    # independent token blocks
            vmem_limit_bytes=vmem_limit,
        ),
    )(ids_arg, emb_table)

    out = out_flat[:n_tok, :d_model]
    return out.reshape(*orig_shape, d_model)


# --------------------------------------------------------------------------- #
# Demo / correctness check
# --------------------------------------------------------------------------- #
if __name__ == "__main__":
    d_model = 128
    vocab_size = 64
    B, S = 2, 8

    key = jax.random.PRNGKey(0)
    k_emb, k_ids = jax.random.split(key)

    # nn.Embedding default init is N(0, 1).
    emb_table = jax.random.normal(k_emb, (vocab_size, d_model), dtype=jnp.float32)
    ids = jax.random.randint(k_ids, (B, S), 0, vocab_size, dtype=jnp.int32)
    ref = jnp.take(emb_table, ids, axis=0) * math.sqrt(d_model)

    # Default path = one-hot MXU matmul (f32 MXU may use multi-pass approximation,
    # so the tolerance is looser there); then force the other two paths.
    for p, tol in ((None, 2e-2), ("gather", 1e-5), ("hbm", 1e-5)):
        out = jax.block_until_ready(input_embeddings(ids, emb_table, path=p))
        assert out.shape == (B, S, d_model), (p, out.shape)
        assert jnp.allclose(out, ref, atol=tol, rtol=tol), (p, float(jnp.max(jnp.abs(out - ref))))

    # Column-padding coverage: d_model not a lane multiple, vocab not a sublane multiple.
    d2, v2 = 96, 50
    k2e, k2i = jax.random.split(jax.random.PRNGKey(1))
    tab2 = jax.random.normal(k2e, (v2, d2), dtype=jnp.float32)
    ids2 = jax.random.randint(k2i, (B, S), 0, v2, dtype=jnp.int32)
    ref2 = jnp.take(tab2, ids2, axis=0) * math.sqrt(d2)
    out2 = jax.block_until_ready(input_embeddings(ids2, tab2))
    assert out2.shape == (B, S, d2)
    assert jnp.allclose(out2, ref2, atol=2e-2, rtol=2e-2), float(jnp.max(jnp.abs(out2 - ref2)))

    print("KERNEL_OK")
</pallas_src>

<mosaic_0001>
module attributes {stable_mosaic.version = 11 : i64} {
  func.func @_embed_onehot_kernel(%arg0: i32, %arg1: memref<16x1xi32, #tpu.memory_space<vmem>>, %arg2: memref<64x128xf32, #tpu.memory_space<vmem>>, %arg3: memref<16x128xf32, #tpu.memory_space<vmem>>) attributes {dimension_semantics = [#tpu.dimension_semantics<parallel>], iteration_bounds = array<i64: 1>, scalar_prefetch = 0 : i64, scratch_operands = 0 : i64, tpu.core_type = #tpu.core_type<tc>, window_params = [{transform_indices = @transform_0, window_bounds = array<i64: 16, 1>}, {pipeline_mode = #tpu.pipeline_mode<synchronous>, transform_indices = @transform_1, window_bounds = array<i64: 64, 128>}, {transform_indices = @transform_2, window_bounds = array<i64: 16, 128>}]} {
    %c0 = arith.constant 0 : index
    %c0_0 = arith.constant 0 : index
    %0 = vector.load %arg1[%c0, %c0_0] : memref<16x1xi32, #tpu.memory_space<vmem>>, vector<16x1xi32>
    %1 = tpu.iota {dimensions = array<i32: 1>} : vector<16x64xi32>
    %2 = vector.broadcast %0 : vector<16x1xi32> to vector<16x64xi32>
    %3 = arith.cmpi eq, %2, %1 : vector<16x64xi32>
    %cst = arith.constant 11.3137083 : f32
    %cst_1 = arith.constant 0.000000e+00 : f32
    %4 = vector.broadcast %cst : f32 to vector<16x64xf32>
    %5 = vector.broadcast %cst_1 : f32 to vector<16x64xf32>
    %6 = arith.select %3, %4, %5 : vector<16x64xi1>, vector<16x64xf32>
    %c0_2 = arith.constant 0 : index
    %c0_3 = arith.constant 0 : index
    %7 = vector.load %arg2[%c0_2, %c0_3] : memref<64x128xf32, #tpu.memory_space<vmem>>, vector<64x128xf32>
    %cst_4 = arith.constant dense<0.000000e+00> : vector<16x128xf32>
    %8 = tpu.matmul %6, %7, %cst_4 {dimension_numbers = #tpu.dot_dimension_numbers<[1], [0], [0], [1], [0, 0, 1, 1], [], []>} : vector<16x64xf32>, vector<64x128xf32>, vector<16x128xf32> -> vector<16x128xf32>
    %c0_5 = arith.constant 0 : index
    %c0_6 = arith.constant 0 : index
    %9 = vector.load %arg3[%c0_5, %c0_6] : memref<16x128xf32, #tpu.memory_space<vmem>>, vector<16x128xf32>
    tpu.vector_store %arg3[%c0_5, %c0_6], %8 {strides = array<i32>} : memref<16x128xf32, #tpu.memory_space<vmem>>, vector<16x128xf32>,
    return
  }
  func.func @transform_0(%arg0: i32) -> (i32, i32) {
    %c0_i32 = arith.constant 0 : i32
    %c0_i32_0 = arith.constant 0 : i32
    return %arg0, %c0_i32 : i32, i32
  }
  func.func @transform_1(%arg0: i32) -> (i32, i32) {
    %c0_i32 = arith.constant 0 : i32
    %c0_i32_0 = arith.constant 0 : i32
    %c0_i32_1 = arith.constant 0 : i32
    return %c0_i32, %c0_i32_0 : i32, i32
  }
  func.func @transform_2(%arg0: i32) -> (i32, i32) {
    %c0_i32 = arith.constant 0 : i32
    %c0_i32_0 = arith.constant 0 : i32
    return %arg0, %c0_i32 : i32, i32
  }
}

</mosaic_0001>

<bundles_post_ra>
// kernel: tpu_custom_call.1
= control target key start
LH: loop header
LB: loop body
LE: loop exit
PB: predicated region body
PF: predicated region fallthrough
CT: control target
= control target key end

     0   :  { %7 = vsyncpa [#allocation3], 0  ;;  %s270_s0 = inlined_call_operand.vmem [shape: s32[16,1], index: 0, kind: input, shape index: {}]   ;;  %s271_s1 = inlined_call_operand.hbm [shape: f32[64,128], index: 1, kind: input, shape index: {}]   ;;  %s272_s2 = inlined_call_operand.hbm [shape: f32[16,128], index: 2, kind: output, shape index: {}]  }
   0x1   :  { %8 = vsyncpa [#allocation4], 0  ;;  %s231_s9 = smov [#allocation2]  }
   0x2   :  { %s16_s10 = sshll.u32 %s231_s9, 4  ;;  %s17_s10 = int_to_ptr.vmem [resolvable:$true] %s16_s10 }
   0x3   :  { %s195_s11 = scalar_lea.vmem %s17_s10, 1024  ;;  %p200_p1 = scmp.lt.s32.totalorder %s17_s10, %s17_s10 }
   0x4   :  { %p196_p0 = scmp.ne.s32.totalorder %s17_s10, %s195_s11  ;;  %p201_p2 = scmp.lt.s32.totalorder %s195_s11, %s195_s11 }
   0x6   :  { %p202_p3 = por %p201_p2, %p200_p1 }
   0x8   :  { %p203_p4 = pnand %p202_p3, %p196_p0 }
   0xa   :  { %206 = shalt.err (!%p203_p4)
}
   0xb   :  { %s232_s12 = smov 128   ;;  %s233_s13 = smov 8  }
   0xc   :  { %22 = dma.hbm_to_vmem [thread:$0]  %s271_s1, 1024, %s17_s10, [#allocation3], %s232_s12, %s232_s12, %s233_s13  }
   0xd   :  { %227 = dma.done.wait [#allocation3], 1024  }
   0xe   :  { %228 = vsyncadd [#allocation3], 4294966272  ;;  %v234_v0 = vmov 0   ;;  %v26_v1 = vld [vmem:[%s270_s0] sm:$0xff]  ;;  %v47_v2 = vld [vmem:[#allocation2 + $0x38] sm:$0xff]  ;;  %v28_v11 = vlaneseq  ;;  %vm48_vm0 = vcmask 523264  }
   0xf   :  { %186 = vset.pattern.permute.xlu0 %v234_v0  ;;  %161 = vmatprep.subr.mxu0 %v47_v2  ;;  %v46_v3 = vld [vmem:[#allocation2 + $0x30] sm:$0xff]  ;;  %v27_v4 = vld [vmem:[%s270_s0 + $0x8] sm:$0xff]  ;;  %v44_v6 = vld [vmem:[#allocation2 + $0x20] sm:$0xff]  ;;  %v235_v14 = vmov 0.0   ;;  %s236_s0 = smov [#allocation5]  }
  0x10   :  { %31 = vperm.xlu0 %186, %v26_v1   ;;  %162 = vmatpush3.msra.mxu0 %v47_v2  ;;  %v45_v5 = vld [vmem:[#allocation2 + $0x28] sm:$0xff]  ;;  %v43_v7 = vld [vmem:[#allocation2 + $0x18] sm:$0xff]  ;;  %v42_v8 = vld [vmem:[#allocation2 + $0x10] sm:$0xff]  ;;  %v29_v12 = vand.u32 127, %v28_v11  ;;  %s137_s1 = sshll.u32 %s236_s0, 4  ;;  %s138_s1 = int_to_ptr.vmem [resolvable:$true] %s137_s1 }
  0x11   :  { %163 = vmatprep.subr.mxu0 %v46_v3  ;;  %v41_v9 = vld [vmem:[#allocation2 + $0x8] sm:$0xff]  ;;  %v40_v10 = vld [vmem:[#allocation2] sm:$0xff]  ;;  %s207_s20 = scalar_lea.vmem %s138_s1, 256  ;;  %p212_p6 = scmp.lt.s32.totalorder %s138_s1, %s138_s1 }
  0x12   :  { %164 = vmatpush3.msra.mxu0 %v46_v3  ;;  %p208_p5 = scmp.ne.s32.totalorder %s138_s1, %s207_s20  ;;  %p213_p7 = scmp.lt.s32.totalorder %s207_s20, %s207_s20 }
  0x13   :  { %165 = vmatprep.subr.mxu0 %v45_v5 }
  0x14   :  { %34 = vperm.xlu0 %186, %v27_v4   ;;  %166 = vmatpush3.msra.mxu0 %v45_v5  ;;  %p214_p8 = por %p213_p7, %p212_p6 }
  0x15   :  { %167 = vmatprep.subr.mxu0 %v44_v6 }
  0x16   :  { %168 = vmatpush3.msra.mxu0 %v44_v6  ;;  %p215_p9 = pnand %p214_p8, %p208_p5 }
  0x17   :  { %169 = vmatprep.subr.mxu0 %v43_v7 }
  0x18   :  { %170 = vmatpush3.msra.mxu0 %v43_v7 }
  0x19   :  { %171 = vmatprep.subr.mxu0 %v42_v8 }
  0x1a   :  { %172 = vmatpush3.msra.mxu0 %v42_v8 }
  0x1b   :  { %173 = vmatprep.subr.mxu0 %v41_v9 }
  0x1c   :  { %174 = vmatpush3.msra.mxu0 %v41_v9 }
  0x1d   :  { %175 = vmatprep.subr.mxu0 %v40_v10 }
  0x1e   :  { %176 = vmatpush3.msra.mxu0 %v40_v10 }
  0x8b   :  { %v32_v13 = vpop.permute.xlu0 %31 }
  0x8c   :  { %vm36_vm1 = vcmp.eq.s32.totalorder %v32_v13, %v29_v12 }
  0x8d   :  { %v38_v15 = vsel %vm36_vm1, 11.313708, %v235_v14 }
  0x8e   :  { %177 = vmatprep.mubr.msk.f32.mxu0 %vm48_vm0, %v38_v15 }
  0x8f   :  { %v35_v16 = vpop.permute.xlu0 %34 }
  0x90   :  { %vm37_vm2 = vcmp.eq.s32.totalorder %v35_v16, %v29_v12 }
  0x91   :  { %v39_v17 = vsel %vm37_vm2, 11.313708, %v235_v14 }
  0x92   :  { %178 = vmatmul.mubr.msk.f32.vlgmr.msra.gmra.mxu0 %vm48_vm0, %v39_v17 }
 0x152   :  { %v179_v18 = vpop.f32.mrf.mxu0 }
 0x153   :  { %131 = vst [vmem:[#allocation5 + $0x8] sm:$0xff] %v179_v18 }
 0x154   :  { %v121_v19 = vpop.f32.mrf.mxu0 }
 0x155   :  { %130 = vst [vmem:[#allocation5] sm:$0xff] %v121_v19 }
 0x156   :  { %218 = shalt.err (!%p215_p9)
}
 0x157   :  { %143 = dma.vmem_to_hbm [thread:$0]  %s138_s1, 256, %s272_s2, [#allocation4], %s232_s12, %s232_s12, %s233_s13  }
 0x158   :  { %229 = dma.done.wait [#allocation4], 256  }
 0x159   :  { %230 = vsyncadd [#allocation4], 4294967040 }
 0x15a   :  { %147 = vsyncpa [#allocation3], 1 }
 0x15b   :  { %148 = vsyncpa [#allocation4], 1 }

</bundles_post_ra>
